<compile_context>
chip_gen: v7x
topology: tpu7x:2x2x1
jax: 0.10.0
libtpu: 0.0.40
codegen_flags: <defaults>
</compile_context>

<pallas_src>
import functools

import jax
import jax.numpy as jnp
from jax import lax
from jax.experimental import pallas as pl
from jax.experimental.pallas import tpu as pltpu


# ---------------------------------------------------------------------------
# Pallas kernel.  Grid = (batch, pass, row_tile), channel-major (C, lanes).
# ---------------------------------------------------------------------------
def _attention_gate_kernel(*refs, Cin, W, Lb, Bh, n_tiles, n_passes, tiled, inv_hw):
    if tiled:
        (x_ref, xt_ref, xb_ref, g_ref, ml_ref, mr_ref,
         wg_ref, wx_ref, bf_ref,
         wca1_ref, bca1_ref, wca2_ref, bca2_ref, wpsi_ref, bpsi_ref,
         out_ref, xe_ref, sum_ref) = refs
    else:
        (x_ref, g_ref, ml_ref, mr_ref,
         wg_ref, wx_ref, bf_ref,
         wca1_ref, bca1_ref, wca2_ref, bca2_ref, wpsi_ref, bpsi_ref,
         out_ref, xe_ref, sum_ref) = refs
        xt_ref = xb_ref = None

    p = pl.program_id(1)
    t = pl.program_id(2)
    xdt = x_ref.dtype                                   # bf16 activation storage

    mid = x_ref[0]                                      # (Cin, Lb) current row tile
    g2d = g_ref[0]                                      # (Cg,  Lb) resized gate tile

    # ---- rebuild the flat (W+1)-bordered tile in VMEM (no host-side pad) ----
    if tiled:
        # one real halo row above / below the tile (zeroed at the image edges)
        top_w = jnp.where(t > 0, xt_ref[0][:, Bh - W:], 0).astype(xdt)
        bot_w = jnp.where(t < n_tiles - 1, xb_ref[0][:, :W], 0).astype(xdt)
    else:
        top_w = jnp.zeros((Cin, W), xdt)
        bot_w = jnp.zeros((Cin, W), xdt)
    zcol = jnp.zeros((Cin, 1), xdt)
    xe_ref[:, 0:1] = zcol
    xe_ref[:, 1:W + 1] = top_w
    xe_ref[:, W + 1:W + 1 + Lb] = mid
    xe_ref[:, W + 1 + Lb:W + 1 + Lb + W] = bot_w
    xe_ref[:, W + 1 + Lb + W:W + 2 + Lb + W] = zcol

    mask_l = ml_ref[...]                                # (1, Lb) bf16, col >= 1
    mask_r = mr_ref[...]                                # (1, Lb) bf16, col <= W-2

    # ---- W_g(1x1)+BN and W_x(3x3,pad=1)+BN: ten bf16 MXU dots, f32 acc ----
    pre = jnp.dot(wg_ref[...], g2d, preferred_element_type=jnp.float32)
    for k, (dy, dx) in enumerate([(a, b) for a in range(3) for b in range(3)]):
        if dy == 1 and dx == 1:
            win = mid                                   # un-shifted tap
        else:
            start = (W + 1) + (dy - 1) * W + (dx - 1)   # static lane offset
            win = xe_ref[:, start:start + Lb]
        # NOTE(v5e): these mask multiplies are bf16; on v5e (no bf16 VPU) they
        # could be kept in f32, but the dot operands should remain bf16.
        if dx == 0:
            win = win * mask_l
        elif dx == 2:
            win = win * mask_r
        pre = pre + jnp.dot(wx_ref[k], win, preferred_element_type=jnp.float32)

    spatial_att = jax.nn.sigmoid(pre + bf_ref[...])     # (Ci, Lb) f32

    # ---- pass 0: accumulate the exact full-image GAP of spatial_att ----
    @pl.when((p == 0) & (t == 0))
    def _():
        sum_ref[...] = jnp.zeros_like(sum_ref)

    @pl.when(p == 0)
    def _():
        sum_ref[...] += jnp.sum(spatial_att, axis=1, keepdims=True)

    # ---- final pass: channel attention, psi, gated output ----
    @pl.when(p == n_passes - 1)
    def _():
        pooled = sum_ref[...] * inv_hw                                  # (Ci, 1)
        h = jnp.maximum(
            jnp.sum(wca1_ref[...] * pooled, axis=0, keepdims=True) + bca1_ref[...],
            0.0)                                                        # (1, Cr)
        channel_att = jax.nn.sigmoid(
            jnp.sum(wca2_ref[...] * h, axis=1, keepdims=True) + bca2_ref[...])  # (Ci,1)
        att = spatial_att * channel_att                                 # (Ci, Lb)
        psi = jax.nn.sigmoid(
            jnp.sum(att * wpsi_ref[...], axis=0, keepdims=True) + bpsi_ref[...])  # (1,Lb)
        out_ref[0] = (mid.astype(jnp.float32) * psi).astype(out_ref.dtype)


# ---------------------------------------------------------------------------
# Tiling / VMEM sizing helpers.
# ---------------------------------------------------------------------------
def _halo_block(W):
    if W % 128 == 0:
        return W
    if 128 % W == 0:
        return 128
    return None                               # unsupported width for row tiling


def _select_tiling(H, W, tile_rows):
    """Pick rows-per-tile R (R | H), number of tiles, halo lane-block size Bh."""
    HW = H * W
    if tile_rows is not None:
        R = int(tile_rows)
        if R <= 0 or H % R != 0:
            raise ValueError("tile_rows must be a positive divisor of H")
        if R == H:
            return H, 1, 0
        Bh = _halo_block(W)
        if Bh is None or (R * W) % Bh != 0:
            raise ValueError("unsupported (W, tile_rows) combination for row tiling")
        return R, H // R, Bh

    if HW <= 16384:                           # whole image easily fits VMEM
        return H, 1, 0
    Bh = _halo_block(W)
    if Bh is None:
        # TODO(synk): widths that are neither a divisor nor a multiple of 128
        # fall back to whole-image blocks (may exceed VMEM for huge images).
        return H, 1, 0
    R = max(1, min(H, 8192 // max(W, 1)))
    while R > 1 and (H % R != 0 or (R * W) % Bh != 0):
        R -= 1
    if R <= 1 or R >= H or H % R != 0 or (R * W) % Bh != 0:
        return H, 1, 0
    return R, H // R, Bh


def _vmem_limit_bytes(Cin, Cg, Ci, Lb, W, Bh, out_itemsize, tiled):
    bf = 2
    lext = Lb + 2 * W + 2
    need = 2 * (Cin * Lb * bf + Cg * Lb * bf + Cin * Lb * out_itemsize)   # 2x-buffered blocks
    if tiled:
        need += 2 * 2 * Cin * Bh * bf                                     # halo blocks
    need += Cin * lext * bf                                               # bordered-x scratch
    need += 3 * Cin * Lb * bf                                             # tap windows in flight
    need += 4 * Ci * Lb * 4                                               # pre/sa/att f32 temps
    need += 2 * Lb * bf + (2 << 20)                                       # masks + headroom
    try:
        cap = int(pltpu.get_tpu_info().vmem_capacity_bytes)
    except Exception:
        cap = 128 * 1024 * 1024
    limit = max(2 * need, 32 * 1024 * 1024)
    limit = min(limit, cap * 3 // 4)
    return int(max(limit, need))


# ---------------------------------------------------------------------------
# Wrapper: layout plumbing + pallas_call.
# ---------------------------------------------------------------------------
def attention_gate(x_nhwc, g_nhwc, kernel_params, *, tile_rows=None,
                   out_dtype=jnp.bfloat16):
    """x_nhwc: (B,H,W,Cin), g_nhwc: (B,Hg,Wg,Cg) -> NCHW (B,Cin,H,W) out_dtype."""
    (wg_b, wx_b, b_fused, wca1, bca1, wca2, bca2, wpsi, bpsi) = kernel_params
    B, H, W, Cin = x_nhwc.shape
    Cg = g_nhwc.shape[3]
    Ci = wg_b.shape[0]
    HW = H * W

    # glue: bilinear upsample of the gate (== F.interpolate, align_corners=False)
    g_res = jax.image.resize(g_nhwc, (B, H, W, Cg), method="bilinear")

    # channel-major, flat-spatial, bf16 activation storage (math is f32 in-kernel)
    x_cm = jnp.transpose(x_nhwc, (0, 3, 1, 2)).reshape(B, Cin, HW).astype(jnp.bfloat16)
    g_cm = jnp.transpose(g_res, (0, 3, 1, 2)).reshape(B, Cg, HW).astype(jnp.bfloat16)

    R, n_tiles, Bh = _select_tiling(H, W, tile_rows)
    tiled = n_tiles > 1
    n_passes = 2 if tiled else 1
    Lb = R * W

    # column-validity masks for the +-1 lane shifts (0/1 is exact in bf16)
    w_idx = jnp.arange(Lb, dtype=jnp.int32) % W
    mask_l = (w_idx >= 1).astype(jnp.bfloat16).reshape(1, Lb)
    mask_r = (w_idx <= W - 2).astype(jnp.bfloat16).reshape(1, Lb)

    kern = functools.partial(
        _attention_gate_kernel, Cin=Cin, W=W, Lb=Lb, Bh=Bh,
        n_tiles=n_tiles, n_passes=n_passes, tiled=tiled, inv_hw=1.0 / HW)

    def rep_spec(a):
        nd = a.ndim
        return pl.BlockSpec(a.shape, lambda b, p, t, nd=nd: (0,) * nd)

    inputs = [(x_cm, pl.BlockSpec((1, Cin, Lb), lambda b, p, t: (b, 0, t)))]
    if tiled:
        lpb = Lb // Bh                      # halo lane-blocks per row tile
        nhb = HW // Bh
        inputs += [
            (x_cm, pl.BlockSpec((1, Cin, Bh),
                                lambda b, p, t: (b, 0, jnp.maximum(t * lpb - 1, 0)))),
            (x_cm, pl.BlockSpec((1, Cin, Bh),
                                lambda b, p, t: (b, 0, jnp.minimum((t + 1) * lpb, nhb - 1)))),
        ]
    inputs += [
        (g_cm, pl.BlockSpec((1, Cg, Lb), lambda b, p, t: (b, 0, t))),
        (mask_l, rep_spec(mask_l)), (mask_r, rep_spec(mask_r)),
        (wg_b, rep_spec(wg_b)), (wx_b, rep_spec(wx_b)), (b_fused, rep_spec(b_fused)),
        (wca1, rep_spec(wca1)), (bca1, rep_spec(bca1)),
        (wca2, rep_spec(wca2)), (bca2, rep_spec(bca2)),
        (wpsi, rep_spec(wpsi)), (bpsi, rep_spec(bpsi)),
    ]
    args = [a for a, _ in inputs]
    in_specs = [s for _, s in inputs]

    if tiled:
        # pass 0 parks on tile 0 (never written back with stale data since the
        # index only changes after pass 1 rewrites it); pass 1 writes tile t.
        out_map = lambda b, p, t: (b, 0, t * p)
    else:
        out_map = lambda b, p, t: (b, 0, t)

    vmem_limit = _vmem_limit_bytes(Cin, Cg, Ci, Lb, W, Bh,
                                   jnp.dtype(out_dtype).itemsize, tiled)

    out = pl.pallas_call(
        kern,
        out_shape=jax.ShapeDtypeStruct((B, Cin, HW), out_dtype),
        grid_spec=pltpu.PrefetchScalarGridSpec(
            num_scalar_prefetch=0,
            grid=(B, n_passes, n_tiles),
            in_specs=in_specs,
            out_specs=pl.BlockSpec((1, Cin, Lb), out_map),
            scratch_shapes=[
                pltpu.VMEM((Cin, Lb + 2 * W + 2), jnp.bfloat16),  # bordered x tile
                pltpu.VMEM((Ci, 1), jnp.float32),                 # GAP accumulator
            ]),
        compiler_params=pltpu.CompilerParams(
            dimension_semantics=("parallel", "arbitrary", "arbitrary"),
            vmem_limit_bytes=vmem_limit,
        ),
    )(*args)

    # NCHW output: a free reshape, no transpose pass.
    return out.reshape(B, Cin, H, W)


# ---------------------------------------------------------------------------
# Synthetic module parameters (torch layout) + kernel-layout folding.
# ---------------------------------------------------------------------------
def fold_bn(gamma, beta, mean, var, conv_bias, eps=1e-5):
    scale = gamma / jnp.sqrt(var + eps)
    shift = beta + (conv_bias - mean) * scale
    return scale, shift


def make_params(key, Cin, Cg, Ci):
    Cr = max(Ci // 8, 1)
    ks = jax.random.split(key, 22)
    n = lambda k, s, sc=0.1: sc * jax.random.normal(k, s, jnp.float32)

    mp = dict(
        # W_g: Conv2d(Cg, Ci, 1) + BN(Ci)
        wg=n(ks[0], (Ci, Cg)), bg_conv=n(ks[1], (Ci,)),
        gam_g=1.0 + n(ks[2], (Ci,)), bet_g=n(ks[3], (Ci,)),
        mu_g=n(ks[4], (Ci,)), var_g=0.5 + jnp.abs(n(ks[5], (Ci,))),
        # W_x: Conv2d(Cin, Ci, 3, padding=1) + BN(Ci)
        wx=n(ks[6], (Ci, Cin, 3, 3)), bx_conv=n(ks[7], (Ci,)),
        gam_x=1.0 + n(ks[8], (Ci,)), bet_x=n(ks[9], (Ci,)),
        mu_x=n(ks[10], (Ci,)), var_x=0.5 + jnp.abs(n(ks[11], (Ci,))),
        # channel_att: Conv(Ci, Cr, 1) -> ReLU -> Conv(Cr, Ci, 1) -> Sigmoid
        wca1=n(ks[12], (Cr, Ci)), bca1=n(ks[13], (Cr,)),
        wca2=n(ks[14], (Ci, Cr)), bca2=n(ks[15], (Ci,)),
        # psi: Conv(Ci, 1, 1) + BN(1) + Sigmoid
        wpsi=n(ks[16], (1, Ci)), bpsi_conv=n(ks[17], (1,)),
        gam_p=1.0 + n(ks[18], (1,)), bet_p=n(ks[19], (1,)),
        mu_p=n(ks[20], (1,)), var_p=0.5 + jnp.abs(n(ks[21], (1,))),
    )

    sg, bg = fold_bn(mp["gam_g"], mp["bet_g"], mp["mu_g"], mp["var_g"], mp["bg_conv"])
    sx, bx = fold_bn(mp["gam_x"], mp["bet_x"], mp["mu_x"], mp["var_x"], mp["bx_conv"])
    sp, bp = fold_bn(mp["gam_p"], mp["bet_p"], mp["mu_p"], mp["var_p"], mp["bpsi_conv"])

    # TODO(synk): for channel counts that are not multiples of 8, zero-pad
    # Cg/Cin/Ci here so sublane tiles stay unmasked.
    wg_b = (sg[:, None] * mp["wg"]).astype(jnp.bfloat16)                  # (Ci, Cg)
    wx_b = jnp.stack(
        [sx[:, None] * mp["wx"][:, :, dy, dx] for dy in range(3) for dx in range(3)],
        axis=0).astype(jnp.bfloat16)                                      # (9, Ci, Cin)
    b_fused = (bg + bx).reshape(Ci, 1)                                    # (Ci, 1) f32

    kp = (
        wg_b, wx_b, b_fused,
        jnp.transpose(mp["wca1"]),                # (Ci, Cr) f32
        mp["bca1"].reshape(1, Cr),                # (1, Cr)
        mp["wca2"],                               # (Ci, Cr)
        mp["bca2"].reshape(Ci, 1),                # (Ci, 1)
        (sp[0] * mp["wpsi"][0]).reshape(Ci, 1),   # (Ci, 1)  psi (BN scale folded)
        bp.reshape(1, 1),                         # (1, 1)   psi folded shift
    )
    return mp, kp


# ---------------------------------------------------------------------------
# Pure-JAX reference mirroring the PyTorch module (eval-mode BN).
# ---------------------------------------------------------------------------
def reference(x_nhwc, g_nhwc, mp, quantize=True):
    B, H, W, Cin = x_nhwc.shape
    Cg = g_nhwc.shape[3]
    eps = 1e-5
    hp = lax.Precision.HIGHEST

    g_res = jax.image.resize(g_nhwc, (B, H, W, Cg), method="bilinear")
    if quantize:  # mirror the kernel's bf16 activation storage
        x_nhwc = x_nhwc.astype(jnp.bfloat16).astype(jnp.float32)
        g_res = g_res.astype(jnp.bfloat16).astype(jnp.float32)

    def bn(y, gam, bet, mu, var):
        return (y - mu) / jnp.sqrt(var + eps) * gam + bet

    gc = bn(jnp.einsum("bhwc,oc->bhwo", g_res, mp["wg"], precision=hp) + mp["bg_conv"],
            mp["gam_g"], mp["bet_g"], mp["mu_g"], mp["var_g"])
    w_hwio = jnp.transpose(mp["wx"], (2, 3, 1, 0))
    xc = lax.conv_general_dilated(x_nhwc, w_hwio, (1, 1), "SAME",
                                  dimension_numbers=("NHWC", "HWIO", "NHWC"),
                                  precision=hp) + mp["bx_conv"]
    xc = bn(xc, mp["gam_x"], mp["bet_x"], mp["mu_x"], mp["var_x"])
    sa = jax.nn.sigmoid(gc + xc)
    pooled = jnp.mean(sa, axis=(1, 2), keepdims=True)
    h = jnp.maximum(jnp.einsum("bijc,rc->bijr", pooled, mp["wca1"], precision=hp)
                    + mp["bca1"], 0.0)
    ca = jax.nn.sigmoid(jnp.einsum("bijr,cr->bijc", h, mp["wca2"], precision=hp)
                        + mp["bca2"])
    att = sa * ca
    p = bn(jnp.einsum("bhwc,oc->bhwo", att, mp["wpsi"], precision=hp) + mp["bpsi_conv"],
           mp["gam_p"], mp["bet_p"], mp["mu_p"], mp["var_p"])
    psi = jax.nn.sigmoid(p)
    return jnp.transpose(x_nhwc * psi, (0, 3, 1, 2))


if __name__ == "__main__":
    def run_case(key, B, H, W, Cin, Cg, Hg, Wg, tile_rows):
        Ci = Cin // 2  # inter_channels default (= in_channels // 2)
        k_x, k_g, k_p = jax.random.split(key, 3)
        x_nhwc = jax.random.normal(k_x, (B, H, W, Cin), jnp.float32)
        g_nhwc = jax.random.normal(k_g, (B, Hg, Wg, Cg), jnp.float32)
        mp, kp = make_params(k_p, Cin, Cg, Ci)

        fn = jax.jit(functools.partial(attention_gate, tile_rows=tile_rows))
        out = jax.block_until_ready(fn(x_nhwc, g_nhwc, kp))
        assert out.shape == (B, Cin, H, W), out.shape

        ref = reference(x_nhwc, g_nhwc, mp)
        err = float(jnp.max(jnp.abs(out.astype(jnp.float32) - ref)))
        # bf16 output + bf16 folded weights -> ~1e-2 worst-case rounding.
        assert err < 5e-2, f"max abs error {err}"

    key = jax.random.PRNGKey(0)
    k1, k2 = jax.random.split(key)
    # whole-image, single-pass path
    run_case(k1, B=2, H=16, W=16, Cin=16, Cg=8, Hg=8, Wg=8, tile_rows=None)
    # row-tiled, two-pass path (exercises halos + exact two-pass GAP)
    run_case(k2, B=1, H=32, W=128, Cin=16, Cg=8, Hg=16, Wg=64, tile_rows=8)

    print("KERNEL_OK")
</pallas_src>

<mosaic_0001>
module attributes {stable_mosaic.version = 11 : i64} {
  func.func @_attention_gate_kernel(%arg0: i32, %arg1: i32, %arg2: i32, %arg3: memref<1x16x256xbf16, #tpu.memory_space<vmem>>, %arg4: memref<1x8x256xbf16, #tpu.memory_space<vmem>>, %arg5: memref<1x256xbf16, #tpu.memory_space<vmem>>, %arg6: memref<1x256xbf16, #tpu.memory_space<vmem>>, %arg7: memref<8x8xbf16, #tpu.memory_space<vmem>>, %arg8: memref<9x8x16xbf16, #tpu.memory_space<vmem>>, %arg9: memref<8x1xf32, #tpu.memory_space<vmem>>, %arg10: memref<8x1xf32, #tpu.memory_space<vmem>>, %arg11: memref<1x1xf32, #tpu.memory_space<vmem>>, %arg12: memref<8x1xf32, #tpu.memory_space<vmem>>, %arg13: memref<8x1xf32, #tpu.memory_space<vmem>>, %arg14: memref<8x1xf32, #tpu.memory_space<vmem>>, %arg15: memref<1x1xf32, #tpu.memory_space<vmem>>, %arg16: memref<1x16x256xbf16, #tpu.memory_space<vmem>>, %arg17: memref<16x290xbf16, #tpu.memory_space<vmem>>, %arg18: memref<8x1xf32, #tpu.memory_space<vmem>>) attributes {dimension_semantics = [#tpu.dimension_semantics<parallel>, #tpu.dimension_semantics<arbitrary>, #tpu.dimension_semantics<arbitrary>], iteration_bounds = array<i64: 2, 1, 1>, scalar_prefetch = 0 : i64, scratch_operands = 2 : i64, tpu.core_type = #tpu.core_type<tc>, window_params = [{transform_indices = @transform_0, window_bounds = array<i64: 1, 16, 256>}, {transform_indices = @transform_1, window_bounds = array<i64: 1, 8, 256>}, {pipeline_mode = #tpu.pipeline_mode<synchronous>, transform_indices = @transform_2, window_bounds = array<i64: 1, 256>}, {pipeline_mode = #tpu.pipeline_mode<synchronous>, transform_indices = @transform_3, window_bounds = array<i64: 1, 256>}, {pipeline_mode = #tpu.pipeline_mode<synchronous>, transform_indices = @transform_4, window_bounds = array<i64: 8, 8>}, {pipeline_mode = #tpu.pipeline_mode<synchronous>, transform_indices = @transform_5, window_bounds = array<i64: 9, 8, 16>}, {pipeline_mode = #tpu.pipeline_mode<synchronous>, transform_indices = @transform_6, window_bounds = array<i64: 8, 1>}, {pipeline_mode = #tpu.pipeline_mode<synchronous>, transform_indices = @transform_7, window_bounds = array<i64: 8, 1>}, {pipeline_mode = #tpu.pipeline_mode<synchronous>, transform_indices = @transform_8, window_bounds = array<i64: 1, 1>}, {pipeline_mode = #tpu.pipeline_mode<synchronous>, transform_indices = @transform_9, window_bounds = array<i64: 8, 1>}, {pipeline_mode = #tpu.pipeline_mode<synchronous>, transform_indices = @transform_10, window_bounds = array<i64: 8, 1>}, {pipeline_mode = #tpu.pipeline_mode<synchronous>, transform_indices = @transform_11, window_bounds = array<i64: 8, 1>}, {pipeline_mode = #tpu.pipeline_mode<synchronous>, transform_indices = @transform_12, window_bounds = array<i64: 1, 1>}, {transform_indices = @transform_13, window_bounds = array<i64: 1, 16, 256>}]} {
    %c0 = arith.constant 0 : index
    %c0_0 = arith.constant 0 : index
    %c0_1 = arith.constant 0 : index
    %0 = vector.load %arg3[%c0, %c0_0, %c0_1] : memref<1x16x256xbf16, #tpu.memory_space<vmem>>, vector<1x16x256xbf16>
    %1 = vector.shape_cast %0 : vector<1x16x256xbf16> to vector<16x256xbf16>
    %c0_2 = arith.constant 0 : index
    %c0_3 = arith.constant 0 : index
    %c0_4 = arith.constant 0 : index
    %2 = vector.load %arg4[%c0_2, %c0_3, %c0_4] : memref<1x8x256xbf16, #tpu.memory_space<vmem>>, vector<1x8x256xbf16>
    %3 = vector.shape_cast %2 : vector<1x8x256xbf16> to vector<8x256xbf16>
    %cst = arith.constant 0.000000e+00 : bf16
    %4 = vector.broadcast %cst : bf16 to vector<16x16xbf16>
    %cst_5 = arith.constant 0.000000e+00 : bf16
    %5 = vector.broadcast %cst_5 : bf16 to vector<16x16xbf16>
    %cst_6 = arith.constant 0.000000e+00 : bf16
    %6 = vector.broadcast %cst_6 : bf16 to vector<16x1xbf16>
    %c0_7 = arith.constant 0 : index
    %c0_8 = arith.constant 0 : index
    %7 = vector.load %arg17[%c0_7, %c0_8] : memref<16x290xbf16, #tpu.memory_space<vmem>>, vector<16x1xbf16>
    tpu.vector_store %arg17[%c0_7, %c0_8], %6 {strides = array<i32>} : memref<16x290xbf16, #tpu.memory_space<vmem>>, vector<16x1xbf16>,
    %c0_9 = arith.constant 0 : index
    %c1 = arith.constant 1 : index
    %8 = vector.load %arg17[%c0_9, %c1] : memref<16x290xbf16, #tpu.memory_space<vmem>>, vector<16x16xbf16>
    tpu.vector_store %arg17[%c0_9, %c1], %4 {strides = array<i32>} : memref<16x290xbf16, #tpu.memory_space<vmem>>, vector<16x16xbf16>,
    %c0_10 = arith.constant 0 : index
    %c17 = arith.constant 17 : index
    %9 = vector.load %arg17[%c0_10, %c17] : memref<16x290xbf16, #tpu.memory_space<vmem>>, vector<16x256xbf16>
    tpu.vector_store %arg17[%c0_10, %c17], %1 {strides = array<i32>} : memref<16x290xbf16, #tpu.memory_space<vmem>>, vector<16x256xbf16>,
    %c0_11 = arith.constant 0 : index
    %c273 = arith.constant 273 : index
    %10 = vector.load %arg17[%c0_11, %c273] : memref<16x290xbf16, #tpu.memory_space<vmem>>, vector<16x16xbf16>
    tpu.vector_store %arg17[%c0_11, %c273], %5 {strides = array<i32>} : memref<16x290xbf16, #tpu.memory_space<vmem>>, vector<16x16xbf16>,
    %c0_12 = arith.constant 0 : index
    %c289 = arith.constant 289 : index
    %11 = vector.load %arg17[%c0_12, %c289] : memref<16x290xbf16, #tpu.memory_space<vmem>>, vector<16x1xbf16>
    tpu.vector_store %arg17[%c0_12, %c289], %6 {strides = array<i32>} : memref<16x290xbf16, #tpu.memory_space<vmem>>, vector<16x1xbf16>,
    %c0_13 = arith.constant 0 : index
    %c0_14 = arith.constant 0 : index
    %12 = vector.load %arg5[%c0_13, %c0_14] : memref<1x256xbf16, #tpu.memory_space<vmem>>, vector<1x256xbf16>
    %c0_15 = arith.constant 0 : index
    %c0_16 = arith.constant 0 : index
    %13 = vector.load %arg6[%c0_15, %c0_16] : memref<1x256xbf16, #tpu.memory_space<vmem>>, vector<1x256xbf16>
    %c0_17 = arith.constant 0 : index
    %c0_18 = arith.constant 0 : index
    %14 = vector.load %arg7[%c0_17, %c0_18] : memref<8x8xbf16, #tpu.memory_space<vmem>>, vector<8x8xbf16>
    %cst_19 = arith.constant dense<0.000000e+00> : vector<8x256xf32>
    %15 = tpu.matmul %14, %3, %cst_19 {dimension_numbers = #tpu.dot_dimension_numbers<[1], [0], [0], [1], [0, 0, 1, 1], [], []>} : vector<8x8xbf16>, vector<8x256xbf16>, vector<8x256xf32> -> vector<8x256xf32>
    %c0_20 = arith.constant 0 : index
    %c0_21 = arith.constant 0 : index
    %16 = vector.load %arg17[%c0_20, %c0_21] : memref<16x290xbf16, #tpu.memory_space<vmem>>, vector<16x256xbf16>
    %17 = vector.broadcast %12 : vector<1x256xbf16> to vector<16x256xbf16>
    %18 = arith.mulf %16, %17 : vector<16x256xbf16>
    %c0_22 = arith.constant 0 : index
    %c0_23 = arith.constant 0 : index
    %c0_24 = arith.constant 0 : index
    %19 = vector.load %arg8[%c0_22, %c0_23, %c0_24] : memref<9x8x16xbf16, #tpu.memory_space<vmem>>, vector<1x8x16xbf16>
    %20 = vector.shape_cast %19 : vector<1x8x16xbf16> to vector<8x16xbf16>
    %cst_25 = arith.constant dense<0.000000e+00> : vector<8x256xf32>
    %21 = tpu.matmul %20, %18, %cst_25 {dimension_numbers = #tpu.dot_dimension_numbers<[1], [0], [0], [1], [0, 0, 1, 1], [], []>} : vector<8x16xbf16>, vector<16x256xbf16>, vector<8x256xf32> -> vector<8x256xf32>
    %22 = arith.addf %15, %21 : vector<8x256xf32>
    %c0_26 = arith.constant 0 : index
    %c1_27 = arith.constant 1 : index
    %23 = vector.load %arg17[%c0_26, %c1_27] : memref<16x290xbf16, #tpu.memory_space<vmem>>, vector<16x256xbf16>
    %c1_28 = arith.constant 1 : index
    %c0_29 = arith.constant 0 : index
    %c0_30 = arith.constant 0 : index
    %24 = vector.load %arg8[%c1_28, %c0_29, %c0_30] : memref<9x8x16xbf16, #tpu.memory_space<vmem>>, vector<1x8x16xbf16>
    %25 = vector.shape_cast %24 : vector<1x8x16xbf16> to vector<8x16xbf16>
    %cst_31 = arith.constant dense<0.000000e+00> : vector<8x256xf32>
    %26 = tpu.matmul %25, %23, %cst_31 {dimension_numbers = #tpu.dot_dimension_numbers<[1], [0], [0], [1], [0, 0, 1, 1], [], []>} : vector<8x16xbf16>, vector<16x256xbf16>, vector<8x256xf32> -> vector<8x256xf32>
    %27 = arith.addf %22, %26 : vector<8x256xf32>
    %c0_32 = arith.constant 0 : index
    %c2 = arith.constant 2 : index
    %28 = vector.load %arg17[%c0_32, %c2] : memref<16x290xbf16, #tpu.memory_space<vmem>>, vector<16x256xbf16>
    %29 = vector.broadcast %13 : vector<1x256xbf16> to vector<16x256xbf16>
    %30 = arith.mulf %28, %29 : vector<16x256xbf16>
    %c2_33 = arith.constant 2 : index
    %c0_34 = arith.constant 0 : index
    %c0_35 = arith.constant 0 : index
    %31 = vector.load %arg8[%c2_33, %c0_34, %c0_35] : memref<9x8x16xbf16, #tpu.memory_space<vmem>>, vector<1x8x16xbf16>
    %32 = vector.shape_cast %31 : vector<1x8x16xbf16> to vector<8x16xbf16>
    %cst_36 = arith.constant dense<0.000000e+00> : vector<8x256xf32>
    %33 = tpu.matmul %32, %30, %cst_36 {dimension_numbers = #tpu.dot_dimension_numbers<[1], [0], [0], [1], [0, 0, 1, 1], [], []>} : vector<8x16xbf16>, vector<16x256xbf16>, vector<8x256xf32> -> vector<8x256xf32>
    %34 = arith.addf %27, %33 : vector<8x256xf32>
    %c0_37 = arith.constant 0 : index
    %c16 = arith.constant 16 : index
    %35 = vector.load %arg17[%c0_37, %c16] : memref<16x290xbf16, #tpu.memory_space<vmem>>, vector<16x256xbf16>
    %36 = vector.broadcast %12 : vector<1x256xbf16> to vector<16x256xbf16>
    %37 = arith.mulf %35, %36 : vector<16x256xbf16>
    %c3 = arith.constant 3 : index
    %c0_38 = arith.constant 0 : index
    %c0_39 = arith.constant 0 : index
    %38 = vector.load %arg8[%c3, %c0_38, %c0_39] : memref<9x8x16xbf16, #tpu.memory_space<vmem>>, vector<1x8x16xbf16>
    %39 = vector.shape_cast %38 : vector<1x8x16xbf16> to vector<8x16xbf16>
    %cst_40 = arith.constant dense<0.000000e+00> : vector<8x256xf32>
    %40 = tpu.matmul %39, %37, %cst_40 {dimension_numbers = #tpu.dot_dimension_numbers<[1], [0], [0], [1], [0, 0, 1, 1], [], []>} : vector<8x16xbf16>, vector<16x256xbf16>, vector<8x256xf32> -> vector<8x256xf32>
    %41 = arith.addf %34, %40 : vector<8x256xf32>
    %c4 = arith.constant 4 : index
    %c0_41 = arith.constant 0 : index
    %c0_42 = arith.constant 0 : index
    %42 = vector.load %arg8[%c4, %c0_41, %c0_42] : memref<9x8x16xbf16, #tpu.memory_space<vmem>>, vector<1x8x16xbf16>
    %43 = vector.shape_cast %42 : vector<1x8x16xbf16> to vector<8x16xbf16>
    %cst_43 = arith.constant dense<0.000000e+00> : vector<8x256xf32>
    %44 = tpu.matmul %43, %1, %cst_43 {dimension_numbers = #tpu.dot_dimension_numbers<[1], [0], [0], [1], [0, 0, 1, 1], [], []>} : vector<8x16xbf16>, vector<16x256xbf16>, vector<8x256xf32> -> vector<8x256xf32>
    %45 = arith.addf %41, %44 : vector<8x256xf32>
    %c0_44 = arith.constant 0 : index
    %c18 = arith.constant 18 : index
    %46 = vector.load %arg17[%c0_44, %c18] : memref<16x290xbf16, #tpu.memory_space<vmem>>, vector<16x256xbf16>
    %47 = vector.broadcast %13 : vector<1x256xbf16> to vector<16x256xbf16>
    %48 = arith.mulf %46, %47 : vector<16x256xbf16>
    %c5 = arith.constant 5 : index
    %c0_45 = arith.constant 0 : index
    %c0_46 = arith.constant 0 : index
    %49 = vector.load %arg8[%c5, %c0_45, %c0_46] : memref<9x8x16xbf16, #tpu.memory_space<vmem>>, vector<1x8x16xbf16>
    %50 = vector.shape_cast %49 : vector<1x8x16xbf16> to vector<8x16xbf16>
    %cst_47 = arith.constant dense<0.000000e+00> : vector<8x256xf32>
    %51 = tpu.matmul %50, %48, %cst_47 {dimension_numbers = #tpu.dot_dimension_numbers<[1], [0], [0], [1], [0, 0, 1, 1], [], []>} : vector<8x16xbf16>, vector<16x256xbf16>, vector<8x256xf32> -> vector<8x256xf32>
    %52 = arith.addf %45, %51 : vector<8x256xf32>
    %c0_48 = arith.constant 0 : index
    %c32 = arith.constant 32 : index
    %53 = vector.load %arg17[%c0_48, %c32] : memref<16x290xbf16, #tpu.memory_space<vmem>>, vector<16x256xbf16>
    %54 = vector.broadcast %12 : vector<1x256xbf16> to vector<16x256xbf16>
    %55 = arith.mulf %53, %54 : vector<16x256xbf16>
    %c6 = arith.constant 6 : index
    %c0_49 = arith.constant 0 : index
    %c0_50 = arith.constant 0 : index
    %56 = vector.load %arg8[%c6, %c0_49, %c0_50] : memref<9x8x16xbf16, #tpu.memory_space<vmem>>, vector<1x8x16xbf16>
    %57 = vector.shape_cast %56 : vector<1x8x16xbf16> to vector<8x16xbf16>
    %cst_51 = arith.constant dense<0.000000e+00> : vector<8x256xf32>
    %58 = tpu.matmul %57, %55, %cst_51 {dimension_numbers = #tpu.dot_dimension_numbers<[1], [0], [0], [1], [0, 0, 1, 1], [], []>} : vector<8x16xbf16>, vector<16x256xbf16>, vector<8x256xf32> -> vector<8x256xf32>
    %59 = arith.addf %52, %58 : vector<8x256xf32>
    %c0_52 = arith.constant 0 : index
    %c33 = arith.constant 33 : index
    %60 = vector.load %arg17[%c0_52, %c33] : memref<16x290xbf16, #tpu.memory_space<vmem>>, vector<16x256xbf16>
    %c7 = arith.constant 7 : index
    %c0_53 = arith.constant 0 : index
    %c0_54 = arith.constant 0 : index
    %61 = vector.load %arg8[%c7, %c0_53, %c0_54] : memref<9x8x16xbf16, #tpu.memory_space<vmem>>, vector<1x8x16xbf16>
    %62 = vector.shape_cast %61 : vector<1x8x16xbf16> to vector<8x16xbf16>
    %cst_55 = arith.constant dense<0.000000e+00> : vector<8x256xf32>
    %63 = tpu.matmul %62, %60, %cst_55 {dimension_numbers = #tpu.dot_dimension_numbers<[1], [0], [0], [1], [0, 0, 1, 1], [], []>} : vector<8x16xbf16>, vector<16x256xbf16>, vector<8x256xf32> -> vector<8x256xf32>
    %64 = arith.addf %59, %63 : vector<8x256xf32>
    %c0_56 = arith.constant 0 : index
    %c34 = arith.constant 34 : index
    %65 = vector.load %arg17[%c0_56, %c34] : memref<16x290xbf16, #tpu.memory_space<vmem>>, vector<16x256xbf16>
    %66 = vector.broadcast %13 : vector<1x256xbf16> to vector<16x256xbf16>
    %67 = arith.mulf %65, %66 : vector<16x256xbf16>
    %c8 = arith.constant 8 : index
    %c0_57 = arith.constant 0 : index
    %c0_58 = arith.constant 0 : index
    %68 = vector.load %arg8[%c8, %c0_57, %c0_58] : memref<9x8x16xbf16, #tpu.memory_space<vmem>>, vector<1x8x16xbf16>
    %69 = vector.shape_cast %68 : vector<1x8x16xbf16> to vector<8x16xbf16>
    %cst_59 = arith.constant dense<0.000000e+00> : vector<8x256xf32>
    %70 = tpu.matmul %69, %67, %cst_59 {dimension_numbers = #tpu.dot_dimension_numbers<[1], [0], [0], [1], [0, 0, 1, 1], [], []>} : vector<8x16xbf16>, vector<16x256xbf16>, vector<8x256xf32> -> vector<8x256xf32>
    %71 = arith.addf %64, %70 : vector<8x256xf32>
    %c0_60 = arith.constant 0 : index
    %c0_61 = arith.constant 0 : index
    %72 = vector.load %arg9[%c0_60, %c0_61] : memref<8x1xf32, #tpu.memory_space<vmem>>, vector<8x1xf32>
    %73 = vector.broadcast %72 : vector<8x1xf32> to vector<8x256xf32>
    %74 = arith.addf %71, %73 : vector<8x256xf32>
    %75 = arith.negf %74 : vector<8x256xf32>
    %76 = math.exp %75 : vector<8x256xf32>
    %cst_62 = arith.constant 1.000000e+00 : f32
    %77 = vector.broadcast %cst_62 : f32 to vector<8x256xf32>
    %78 = arith.addf %77, %76 : vector<8x256xf32>
    %79 = arith.divf %77, %78 : vector<8x256xf32>
    %c0_i32 = arith.constant 0 : i32
    %80 = arith.cmpi eq, %arg1, %c0_i32 : i32
    %c0_i32_63 = arith.constant 0 : i32
    %81 = arith.cmpi eq, %arg2, %c0_i32_63 : i32
    %82 = arith.andi %80, %81 : i1
    %83 = arith.extui %82 : i1 to i32
    %c0_i32_64 = arith.constant 0 : i32
    %84 = arith.cmpi ne, %83, %c0_i32_64 : i32
    scf.if %84 {
      %cst_69 = arith.constant 0.000000e+00 : f32
      %91 = vector.broadcast %cst_69 : f32 to vector<8x1xf32>
      %c0_70 = arith.constant 0 : index
      %c0_71 = arith.constant 0 : index
      %92 = vector.load %arg18[%c0_70, %c0_71] : memref<8x1xf32, #tpu.memory_space<vmem>>, vector<8x1xf32>
      tpu.vector_store %arg18[%c0_70, %c0_71], %91 {strides = array<i32>} : memref<8x1xf32, #tpu.memory_space<vmem>>, vector<8x1xf32>,
    } else {
    }
    %c0_i32_65 = arith.constant 0 : i32
    %85 = arith.cmpi eq, %arg1, %c0_i32_65 : i32
    %86 = arith.extui %85 : i1 to i32
    %c0_i32_66 = arith.constant 0 : i32
    %87 = arith.cmpi ne, %86, %c0_i32_66 : i32
    scf.if %87 {
      %c0_69 = arith.constant 0 : index
      %c0_70 = arith.constant 0 : index
      %91 = vector.load %arg18[%c0_69, %c0_70] : memref<8x1xf32, #tpu.memory_space<vmem>>, vector<8x1xf32>
      %cst_71 = arith.constant dense<0.000000e+00> : vector<8xf32>
      %92 = vector.multi_reduction <add>, %79, %cst_71 [1] : vector<8x256xf32> to vector<8xf32>
      %93 = vector.shape_cast %92 : vector<8xf32> to vector<8x1xf32>
      %94 = arith.addf %91, %93 : vector<8x1xf32>
      %c0_72 = arith.constant 0 : index
      %c0_73 = arith.constant 0 : index
      %95 = vector.load %arg18[%c0_72, %c0_73] : memref<8x1xf32, #tpu.memory_space<vmem>>, vector<8x1xf32>
      tpu.vector_store %arg18[%c0_72, %c0_73], %94 {strides = array<i32>} : memref<8x1xf32, #tpu.memory_space<vmem>>, vector<8x1xf32>,
    } else {
    }
    %c0_i32_67 = arith.constant 0 : i32
    %88 = arith.cmpi eq, %arg1, %c0_i32_67 : i32
    %89 = arith.extui %88 : i1 to i32
    %c0_i32_68 = arith.constant 0 : i32
    %90 = arith.cmpi ne, %89, %c0_i32_68 : i32
    scf.if %90 {
      %c0_69 = arith.constant 0 : index
      %c0_70 = arith.constant 0 : index
      %91 = vector.load %arg18[%c0_69, %c0_70] : memref<8x1xf32, #tpu.memory_space<vmem>>, vector<8x1xf32>
      %cst_71 = arith.constant 3.906250e-03 : f32
      %92 = vector.broadcast %cst_71 : f32 to vector<8x1xf32>
      %93 = arith.mulf %91, %92 : vector<8x1xf32>
      %c0_72 = arith.constant 0 : index
      %c0_73 = arith.constant 0 : index
      %94 = vector.load %arg10[%c0_72, %c0_73] : memref<8x1xf32, #tpu.memory_space<vmem>>, vector<8x1xf32>
      %95 = arith.mulf %94, %93 : vector<8x1xf32>
      %cst_74 = arith.constant dense<0.000000e+00> : vector<1xf32>
      %96 = vector.multi_reduction <add>, %95, %cst_74 [0] : vector<8x1xf32> to vector<1xf32>
      %97 = vector.shape_cast %96 : vector<1xf32> to vector<1x1xf32>
      %c0_75 = arith.constant 0 : index
      %c0_76 = arith.constant 0 : index
      %98 = vector.load %arg11[%c0_75, %c0_76] : memref<1x1xf32, #tpu.memory_space<vmem>>, vector<1x1xf32>
      %99 = arith.addf %97, %98 : vector<1x1xf32>
      %cst_77 = arith.constant 0.000000e+00 : f32
      %100 = vector.broadcast %cst_77 : f32 to vector<1x1xf32>
      %101 = arith.maximumf %99, %100 : vector<1x1xf32>
      %c0_78 = arith.constant 0 : index
      %c0_79 = arith.constant 0 : index
      %102 = vector.load %arg12[%c0_78, %c0_79] : memref<8x1xf32, #tpu.memory_space<vmem>>, vector<8x1xf32>
      %103 = vector.broadcast %101 : vector<1x1xf32> to vector<8x1xf32>
      %104 = arith.mulf %102, %103 : vector<8x1xf32>
      %cst_80 = arith.constant dense<0.000000e+00> : vector<8xf32>
      %105 = vector.multi_reduction <add>, %104, %cst_80 [1] : vector<8x1xf32> to vector<8xf32>
      %106 = vector.shape_cast %105 : vector<8xf32> to vector<8x1xf32>
      %c0_81 = arith.constant 0 : index
      %c0_82 = arith.constant 0 : index
      %107 = vector.load %arg13[%c0_81, %c0_82] : memref<8x1xf32, #tpu.memory_space<vmem>>, vector<8x1xf32>
      %108 = arith.addf %106, %107 : vector<8x1xf32>
      %109 = arith.negf %108 : vector<8x1xf32>
      %110 = math.exp %109 : vector<8x1xf32>
      %cst_83 = arith.constant 1.000000e+00 : f32
      %111 = vector.broadcast %cst_83 : f32 to vector<8x1xf32>
      %112 = arith.addf %111, %110 : vector<8x1xf32>
      %113 = arith.divf %111, %112 : vector<8x1xf32>
      %114 = vector.broadcast %113 : vector<8x1xf32> to vector<8x256xf32>
      %115 = arith.mulf %79, %114 : vector<8x256xf32>
      %c0_84 = arith.constant 0 : index
      %c0_85 = arith.constant 0 : index
      %116 = vector.load %arg14[%c0_84, %c0_85] : memref<8x1xf32, #tpu.memory_space<vmem>>, vector<8x1xf32>
      %117 = vector.broadcast %116 : vector<8x1xf32> to vector<8x256xf32>
      %118 = arith.mulf %115, %117 : vector<8x256xf32>
      %cst_86 = arith.constant dense<0.000000e+00> : vector<256xf32>
      %119 = vector.multi_reduction <add>, %118, %cst_86 [0] : vector<8x256xf32> to vector<256xf32>
      %120 = vector.shape_cast %119 : vector<256xf32> to vector<1x256xf32>
      %c0_87 = arith.constant 0 : index
      %c0_88 = arith.constant 0 : index
      %121 = vector.load %arg15[%c0_87, %c0_88] : memref<1x1xf32, #tpu.memory_space<vmem>>, vector<1x1xf32>
      %122 = vector.broadcast %121 : vector<1x1xf32> to vector<1x256xf32>
      %123 = arith.addf %120, %122 : vector<1x256xf32>
      %124 = arith.negf %123 : vector<1x256xf32>
      %125 = math.exp %124 : vector<1x256xf32>
      %cst_89 = arith.constant 1.000000e+00 : f32
      %126 = vector.broadcast %cst_89 : f32 to vector<1x256xf32>
      %127 = arith.addf %126, %125 : vector<1x256xf32>
      %128 = arith.divf %126, %127 : vector<1x256xf32>
      %129 = arith.extf %1 : vector<16x256xbf16> to vector<16x256xf32>
      %130 = vector.broadcast %128 : vector<1x256xf32> to vector<16x256xf32>
      %131 = arith.mulf %129, %130 : vector<16x256xf32>
      %132 = arith.truncf %131 : vector<16x256xf32> to vector<16x256xbf16>
      %c0_90 = arith.constant 0 : index
      %c0_91 = arith.constant 0 : index
      %c0_92 = arith.constant 0 : index
      %133 = vector.load %arg16[%c0_90, %c0_91, %c0_92] : memref<1x16x256xbf16, #tpu.memory_space<vmem>>, vector<1x16x256xbf16>
      %134 = vector.shape_cast %133 : vector<1x16x256xbf16> to vector<16x256xbf16>
      %135 = vector.shape_cast %132 : vector<16x256xbf16> to vector<1x16x256xbf16>
      tpu.vector_store %arg16[%c0_90, %c0_91, %c0_92], %135 {strides = array<i32>} : memref<1x16x256xbf16, #tpu.memory_space<vmem>>, vector<1x16x256xbf16>,
    } else {
    }
    return
  }
  func.func @transform_0(%arg0: i32, %arg1: i32, %arg2: i32) -> (i32, i32, i32) {
    %c0_i32 = arith.constant 0 : i32
    %c0_i32_0 = arith.constant 0 : i32
    return %arg0, %c0_i32, %arg2 : i32, i32, i32
  }
  func.func @transform_1(%arg0: i32, %arg1: i32, %arg2: i32) -> (i32, i32, i32) {
    %c0_i32 = arith.constant 0 : i32
    %c0_i32_0 = arith.constant 0 : i32
    return %arg0, %c0_i32, %arg2 : i32, i32, i32
  }
  func.func @transform_2(%arg0: i32, %arg1: i32, %arg2: i32) -> (i32, i32) {
    %c0_i32 = arith.constant 0 : i32
    %c0_i32_0 = arith.constant 0 : i32
    %c0_i32_1 = arith.constant 0 : i32
    return %c0_i32, %c0_i32_0 : i32, i32
  }
  func.func @transform_3(%arg0: i32, %arg1: i32, %arg2: i32) -> (i32, i32) {
    %c0_i32 = arith.constant 0 : i32
    %c0_i32_0 = arith.constant 0 : i32
    %c0_i32_1 = arith.constant 0 : i32
    return %c0_i32, %c0_i32_0 : i32, i32
  }
  func.func @transform_4(%arg0: i32, %arg1: i32, %arg2: i32) -> (i32, i32) {
    %c0_i32 = arith.constant 0 : i32
    %c0_i32_0 = arith.constant 0 : i32
    %c0_i32_1 = arith.constant 0 : i32
    return %c0_i32, %c0_i32_0 : i32, i32
  }
  func.func @transform_5(%arg0: i32, %arg1: i32, %arg2: i32) -> (i32, i32, i32) {
    %c0_i32 = arith.constant 0 : i32
    %c0_i32_0 = arith.constant 0 : i32
    %c0_i32_1 = arith.constant 0 : i32
    %c0_i32_2 = arith.constant 0 : i32
    return %c0_i32, %c0_i32_0, %c0_i32_1 : i32, i32, i32
  }
  func.func @transform_6(%arg0: i32, %arg1: i32, %arg2: i32) -> (i32, i32) {
    %c0_i32 = arith.constant 0 : i32
    %c0_i32_0 = arith.constant 0 : i32
    %c0_i32_1 = arith.constant 0 : i32
    return %c0_i32, %c0_i32_0 : i32, i32
  }
  func.func @transform_7(%arg0: i32, %arg1: i32, %arg2: i32) -> (i32, i32) {
    %c0_i32 = arith.constant 0 : i32
    %c0_i32_0 = arith.constant 0 : i32
    %c0_i32_1 = arith.constant 0 : i32
    return %c0_i32, %c0_i32_0 : i32, i32
  }
  func.func @transform_8(%arg0: i32, %arg1: i32, %arg2: i32) -> (i32, i32) {
    %c0_i32 = arith.constant 0 : i32
    %c0_i32_0 = arith.constant 0 : i32
    %c0_i32_1 = arith.constant 0 : i32
    return %c0_i32, %c0_i32_0 : i32, i32
  }
  func.func @transform_9(%arg0: i32, %arg1: i32, %arg2: i32) -> (i32, i32) {
    %c0_i32 = arith.constant 0 : i32
    %c0_i32_0 = arith.constant 0 : i32
    %c0_i32_1 = arith.constant 0 : i32
    return %c0_i32, %c0_i32_0 : i32, i32
  }
  func.func @transform_10(%arg0: i32, %arg1: i32, %arg2: i32) -> (i32, i32) {
    %c0_i32 = arith.constant 0 : i32
    %c0_i32_0 = arith.constant 0 : i32
    %c0_i32_1 = arith.constant 0 : i32
    return %c0_i32, %c0_i32_0 : i32, i32
  }
  func.func @transform_11(%arg0: i32, %arg1: i32, %arg2: i32) -> (i32, i32) {
    %c0_i32 = arith.constant 0 : i32
    %c0_i32_0 = arith.constant 0 : i32
    %c0_i32_1 = arith.constant 0 : i32
    return %c0_i32, %c0_i32_0 : i32, i32
  }
  func.func @transform_12(%arg0: i32, %arg1: i32, %arg2: i32) -> (i32, i32) {
    %c0_i32 = arith.constant 0 : i32
    %c0_i32_0 = arith.constant 0 : i32
    %c0_i32_1 = arith.constant 0 : i32
    return %c0_i32, %c0_i32_0 : i32, i32
  }
  func.func @transform_13(%arg0: i32, %arg1: i32, %arg2: i32) -> (i32, i32, i32) {
    %c0_i32 = arith.constant 0 : i32
    %c0_i32_0 = arith.constant 0 : i32
    return %arg0, %c0_i32, %arg2 : i32, i32, i32
  }
}

</mosaic_0001>

<bundles_post_ra>
// kernel: attention_gate.1
= control target key start
LH: loop header
LB: loop body
LE: loop exit
PB: predicated region body
PF: predicated region fallthrough
CT: control target
= control target key end

     0   :  { %s1777_s29 = smov 0   ;;  %s1779_s30 = smov 0   ;;  %s1961_s0 = inlined_call_operand.vmem [shape: bf16[2,16,256], index: 0, kind: input, shape index: {}]   ;;  %s1962_s1 = inlined_call_operand.vmem [shape: bf16[2,8,256], index: 1, kind: input, shape index: {}]   ;;  %s1963_s2 = inlined_call_operand.vmem [shape: bf16[1,256], index: 2, kind: input, shape index: {}]   ;;  %s1964_s3 = inlined_call_operand.vmem [shape: bf16[1,256], index: 3, kind: input, shape index: {}]   ;;  %s1965_s4 = inlined_call_operand.vmem [shape: bf16[8,8], index: 4, kind: input, shape index: {}]   ;;  %s1966_s5 = inlined_call_operand.vmem [shape: bf16[9,8,16], index: 5, kind: input, shape index: {}]   ;;  %s1967_s6 = inlined_call_operand.vmem [shape: f32[8,1], index: 6, kind: input, shape index: {}]   ;;  %s1968_s7 = inlined_call_operand.vmem [shape: f32[8,1], index: 7, kind: input, shape index: {}]   ;;  %s1969_s8 = inlined_call_operand.<no memory space> [shape: f32[1,1], index: 8, kind: input, shape index: {}]   ;;  %s1970_s9 = inlined_call_operand.vmem [shape: f32[8,1], index: 9, kind: input, shape index: {}]   ;;  %s1971_s10 = inlined_call_operand.vmem [shape: f32[8,1], index: 10, kind: input, shape index: {}]   ;;  %s1972_s11 = inlined_call_operand.vmem [shape: f32[8,1], index: 11, kind: input, shape index: {}]   ;;  %s1973_s13 = inlined_call_operand.vmem [shape: bf16[2,16,256], index: 13, kind: output, shape index: {}]   ;;  %s1974_s12 = inlined_call_operand.<no memory space> [shape: f32[1,1], index: 12, kind: input, shape index: {}]  }
   0x1   :  { %v18_v0 = vstv %s1969_s8  ;;  %v20_v1 = vstv %s1974_s12  ;;  %s1781_s14 = smov 0  }
   0x2   :  { %19 = vst [vmem:[#allocation4] sm:$0x1] %v18_v0  ;;  %21 = vst [vmem:[#allocation5] sm:$0x1] %v20_v1 }
   0x3 LB: > { %s46_s8 = sadd.s32 1, %s1679_s30  ;;  %p1549_p0 = scmp.ge.s32.totalorder %s1683_s14, 1  ;;  %s1683_s14 = sphi %s1781_s14, %s27_s14   ;;  %s1679_s30 = sphi %s1779_s30, %s1976_s30   ;;  %s1675_s29 = sphi %s1777_s29, %s1975_s29  }
   0x4   : > { %p48_p1 = scmp.ge.s32.totalorder %s46_s8, 2  ;;  %p436_p2 = scmp.lt.s32.totalorder %s1683_s14, 3 }
   0x6   : > { %s1978_s8 = smov (%p48_p1, %s46_s8), 0  ;;  %p437_p3 = pnand %p1549_p0, %p436_p2 }
   0x7   : > { %p498_p4 = scmp.lt.s32.totalorder (!%p437_p3), %s1675_s29, 1  ;;  %v578_v2 = vlaneseq (!%p437_p3)  ;;  %v1685_v3 = vmov (!%p437_p3), 1966171168   ;;  %v1686_v6 = vmov (!%p437_p3), 0   ;;  %vm531_vm0 = vcmask (!%p437_p3), 7168   ;;  %s1687_s22 = smov (!%p437_p3), 17  }
   0x8   : > { %440 = sbr.rel (%p437_p3) target bundleno = 937 (0x3a9), region = 72  ;;  %v576_v4 = vunpack.c.l.s4 (!%p437_p3), %v1685_v3  ;;  %642 = vmatprep.mubr.bf16.mxu0 (!%p437_p3), %v1686_v6  ;;  %699 = vmatprep.mubr.bf16.mxu1 (!%p437_p3), %v1686_v6  ;;  %v1566_v7 = vld.sshfl [vmem:[%s1964_s3] sm:$0x11 pattern:$0x75316420] (!%p437_p3)  ;;  %532 = vst.msk [vmem:[#allocation2] sm:$0xff] (!%p437_p3), %vm531_vm0, %v1686_v6 }
   0x9   : > { %v579_v5 = vshrl.u32 (!%p437_p3), %v578_v2, 7  ;;  %1635 = vset.pattern.permute.xlu1 (!%p437_p3), %v1686_v6  ;;  %1636 = vset.pattern.permute.xlu0 (!%p437_p3), %v1686_v6  ;;  %v781_v9 = vcombine.high (!%p437_p3), %v1566_v7, %v1566_v7  ;;  %vm533_vm1 = vcmask (!%p437_p3), 138248   ;;  %v1558_v10 = vld.sshfl [vmem:[%s1963_s2] sm:$0x11 pattern:$0x75316420] (!%p437_p3) }
   0xa   : > { %v577_v8 = vunpack.c.0.s8 (!%p437_p3), %v576_v4  ;;  %534 = vst.msk [vmem:[#allocation2] sm:$0xff] (!%p437_p3), %vm533_vm1, %v1686_v6  ;;  %v574_v14 = vcombine.high (!%p437_p3), %v1558_v10, %v1558_v10  ;;  %s1688_s23 = smov (!%p437_p3), 2   ;;  %s1689_s24 = smov (!%p437_p3), 16   ;;  %vm547_vm2 = vcmask (!%p437_p3), 138240   ;;  %vm557_vm3 = vcmask (!%p437_p3), 269448  }
   0xb   : > { %v1824_v16 = vsub.s32 (!%p437_p3), 0, %v579_v5  ;;  %s1690_s25 = smov (!%p437_p3), 18   ;;  %s1691_s26 = smov (!%p437_p3), 32   ;;  %vm559_vm4 = vcmask (!%p437_p3), 277768   ;;  %vm552_vm5 = vcmask (!%p437_p3), 1047688   ;;  %vm660_vm6 = vcmask (!%p437_p3), 1043456  }
   0xc   : > { %v580_v13 = vsub.s32 (!%p437_p3), %v577_v8, %v579_v5  ;;  %s1692_s27 = smov (!%p437_p3), 34   ;;  %v563_v39 = vld [vmem:[%s1965_s4] sm:$0xf] (!%p437_p3)  ;;  %vm656_vm7 = vcmask (!%p437_p3), 64512   ;;  %vm816_vm8 = vcmask (!%p437_p3), 15360   ;;  %s1693_s20 = smov (!%p437_p3), 127  }
   0xd   : > { %vm606_vm9 = vcmask (!%p437_p3), 130048   ;;  %s1694_s21 = smov (!%p437_p3), 126   ;;  %vm1019_vm10 = vcmask (!%p437_p3), 146432   ;;  %v605_v48 = vld [vmem:[%s1966_s5] sm:$0xf] (!%p437_p3)  ;;  %vm1093_vm11 = vcmask (!%p437_p3), 261120  }
   0xe   : > { %v788_v17 = vrot.slane (!%p437_p3), %v1566_v7, %v580_v13  ;;  %v795_v18 = vrot.slane (!%p437_p3), %v781_v9, %v580_v13  ;;  %v581_v20 = vrot.slane (!%p437_p3), %v1558_v10, %v580_v13  ;;  %v588_v23 = vrot.slane (!%p437_p3), %v574_v14, %v580_v13  ;;  %v1299_v9 = vld [vmem:[%s1967_s6] sm:$0xff] (!%p437_p3) }
   0xf   : > { %s1980_s29 = smov (!%p498_p4, %s1675_s29), 1  ;;  %vm1229_vm12 = vcmask 277504   ;;  %vm722_vm13 = vcmask 1039360   ;;  %vm835_vm14 = vcmask 1031168   ;;  %vm914_vm15 = vcmask 916480  }
  0x10   : > { %s1590_s16 = sshll.u32 %s1980_s29, 4  ;;  %v797_v21 = vpack.i.b16 %v788_v17, %v788_v17  ;;  %v804_v22 = vpack.i.b16 %v795_v18, %v795_v18  ;;  %v590_v24 = vpack.i.b16 %v581_v20, %v581_v20  ;;  %v597_v28 = vpack.i.b16 %v588_v23, %v588_v23  ;;  %s1591_s28 = sshll.u32 %s1980_s29, 3  ;;  %v1564_v23 = vld [vmem:[%s1966_s5 + $0x4] sm:$0xf] }
  0x11   : > { %s505_s19 = scalar_lea.vmem %s1961_s0, %s1590_s16  ;;  %s515_s17 = scalar_lea.vmem %s1962_s1, %s1591_s28  ;;  %vm1112_vm1 = vcmask 785408  }
  0x12   : > { %v1816_v11 = vld [vmem:[%s505_s19] sm:$0xff]  ;;  %v1818_v12 = vld [vmem:[%s505_s19 + $0x8] sm:$0xff]  ;;  %v802_v25 = vrot.slane %v797_v21, %v1824_v16  ;;  %v595_v26 = vrot.slane %v590_v24, %v1824_v16  ;;  %v809_v27 = vrot.slane %v804_v22, %v1824_v16  ;;  %v602_v29 = vrot.slane %v597_v28, %v1824_v16  ;;  %s1699_s28 = smov 94   ;;  %s525_s12 = scalar_lea.vmem %s1973_s13, %s1590_s16 }
  0x13   : > { %v1822_v15 = vcombine.high %v1816_v11, %v1818_v12  ;;  %v1829_v19 = vcombine.low %v1816_v11, %v1818_v12  ;;  %v530_v31 = vld [vmem:[%s515_s17] sm:$0xff] }
  0x14   : > { %812 = vrot.lane.b32.xlu1 %v802_v25, %s1688_s23  ;;  %v1561_v33 = vcombine.high %v530_v31, %v530_v31  ;;  %v1560_v34 = vcombine.low %v530_v31, %v530_v31  ;;  %v1567_v31 = vld [vmem:[%s1966_s5 + $0x8] sm:$0xf] }
  0x15   : > { %545 = vrot.lane.b32.xlu0 %v1822_v15, %s1687_s22 }
  0x16   : > { %1562 = vmatprep.subr.msk.bf16.mxu1 %vm660_vm6, %v1561_v33  ;;  %v662_v38 = vsel %vm660_vm6, %v1560_v34, 0 }
  0x17   : > { %668 = vmatpush1.bf16.msra.mxu1 %v662_v38 }
  0x18   : > { %814 = vrot.lane.b32.xlu1 %v809_v27, %s1688_s23 }
  0x19   : > { %543 = vrot.lane.b32.xlu0 %v1829_v19, %s1687_s22 }
  0x1a   : > { %1563 = vmatmul.mubr.msk.bf16.vlgmr.msra.gmra.mrb[0].mxu1 %vm656_vm7, %v563_v39 }
  0x1b   : > { %875 = vmatprep.mubr.bf16.mxu1 %v1686_v6 }
  0x1c   : > { %893 = vrot.lane.b32.xlu1 %v602_v29, %s1689_s24 }
  0x1d   : > { %891 = vrot.lane.b32.xlu0 %v595_v26, %s1689_s24  ;;  %s1695_s24 = smov 112  }
  0x20   : > { %1017 = vrot.lane.b32.xlu1 %v809_v27, %s1690_s25 }
  0x21   : > { %1015 = vrot.lane.b32.xlu0 %v802_v25, %s1690_s25  ;;  %s1696_s25 = smov 110  }
  0x24   : > { %1091 = vrot.lane.b32.xlu1 %v602_v29, %s1691_s26 }
  0x25   : > { %1089 = vrot.lane.b32.xlu0 %v595_v26, %s1691_s26  ;;  %s1697_s26 = smov 96  }
  0x28   : > { %1227 = vrot.lane.b32.xlu1 %v809_v27, %s1692_s27 }
  0x29   : > { %1225 = vrot.lane.b32.xlu0 %v802_v25, %s1692_s27  ;;  %s1698_s27 = smov 95  }
  0x86   : > { %v813_v35 = vpop.permute.xlu1 %812 }
  0x87   : > { %v546_v30 = vpop.permute.xlu0 %545 }
  0x88   : > { %556 = vst.msk [vmem:[#allocation2 + $0x10] sm:$0xff] %vm547_vm2, %v546_v30 }
  0x89   : > { %558 = vst.msk [vmem:[#allocation2 + $0x10] sm:$0xff] %vm557_vm3, %v1686_v6  ;;  %vm1174_vm3 = vcmask 777216  }
  0x8a   : > { %560 = vst.msk [vmem:[#allocation2 + $0x10] sm:$0xff] %vm559_vm4, %v1686_v6  ;;  %v815_v40 = vpop.permute.xlu1 %814  ;;  %vm1248_vm4 = vcmask 769024  }
  0x8b   : > { %v544_v32 = vpop.permute.xlu0 %543  ;;  %v817_v47 = vsel %vm816_vm8, %v813_v35, %v815_v40 }
  0x8c   : > { %v1844_v36 = vsel %vm547_vm2, %v544_v32, %v546_v30  ;;  %553 = vst.msk [vmem:[#allocation2] sm:$0xff] %vm552_vm5, %v544_v32  ;;  %vm1038_vm2 = vcmask 900096  }
  0x8d   : > { %v604_v37 = vmul.bf16 %v602_v29, %v1844_v36  ;;  %v822_v52 = vmul.bf16 %v817_v47, %v1844_v36  ;;  %v1575_v47 = vld [vmem:[%s1966_s5 + $0x18] sm:$0xf] }
  0x8e   : > { %v894_v44 = vpop.permute.xlu1 %893 }
  0x8f   : > { %610 = vmatprep.subr.bf16.mxu0 %v604_v37  ;;  %v892_v42 = vpop.permute.xlu0 %891 }
  0x90   : > { %v896_v49 = vsel %vm606_vm9, %v892_v42, %v894_v44 }
  0x91   : > { %v1850_v41 = vld [vmem:[#allocation2 + $0x10] sm:$0xff]  ;;  %v901_v54 = vmul.bf16 %v896_v49, %v1844_v36 }
  0x92   : > { %720 = vrot.lane.b32.xlu1 %v1850_v41, %s1693_s20  ;;  %v1018_v51 = vpop.permute.xlu1 %1017  ;;  %v823_v56 = vmul.bf16 %v815_v40, %v1850_v41  ;;  %v902_v57 = vmul.bf16 %v894_v44, %v1850_v41 }
  0x93   : > { %v1854_v43 = vld [vmem:[#allocation2] sm:$0xff]  ;;  %v1016_v50 = vpop.permute.xlu0 %1015  ;;  %v1026_v2 = vmul.bf16 %v1018_v51, %v1850_v41 }
  0x94   : > { %716 = vrot.lane.b32.xlu0 %v1854_v43, %s1693_s20  ;;  %v821_v45 = vmul.bf16 %v1854_v43, %v813_v35  ;;  %v603_v46 = vmul.bf16 %v1854_v43, %v595_v26  ;;  %v1020_v53 = vsel %vm1019_vm10, %v1016_v50, %v1018_v51  ;;  %v900_v59 = vmul.bf16 %v892_v42, %v1854_v43  ;;  %v1569_v35 = vld [vmem:[%s1966_s5 + $0xc] sm:$0xf] }
  0x95   : > { %v1025_v55 = vmul.bf16 %v1020_v53, %v1844_v36  ;;  %v1024_v62 = vmul.bf16 %v1016_v50, %v1854_v43  ;;  %v1577_v53 = vld [vmem:[%s1966_s5 + $0x1c] sm:$0xf] }
  0x96   : > { %829 = vrot.lane.b32.xlu1 %v821_v45, %s1694_s21  ;;  %611 = vmatpush1.bf16.msra.mxu0 %v603_v46  ;;  %v1092_v58 = vpop.permute.xlu1 %1091  ;;  %v1573_v45 = vld [vmem:[%s1966_s5 + $0x14] sm:$0xf] }
  0x97   : > { %v1090_v60 = vpop.permute.xlu0 %1089  ;;  %v1100_v1 = vmul.bf16 %v1092_v58, %v1850_v41 }
  0x98   : > { %718 = vrot.lane.b32.xlu0 %v1844_v36, %s1693_s20  ;;  %v1094_v61 = vsel %vm1093_vm11, %v1090_v60, %v1092_v58  ;;  %v1098_v0 = vmul.bf16 %v1090_v60, %v1854_v43 }
  0x99   : > { %1559 = vmatmul.mubr.msk.bf16.vlgmr.msra.gmra.mrb[0].mxu0 %vm606_vm9, %v605_v48  ;;  %v1099_v63 = vmul.bf16 %v1094_v61, %v1844_v36 }
  0x9a   : > { %831 = vrot.lane.b32.xlu1 %v822_v52, %s1694_s21  ;;  %762 = vmatprep.mubr.bf16.mxu0 %v1686_v6  ;;  %v1228_v3 = vpop.permute.xlu1 %1227 }
  0x9b   : > { %v1226_v4 = vpop.permute.xlu0 %1225  ;;  %v1236_v5 = vmul.bf16 %v1228_v3, %v1850_v41 }
  0x9c   : > { %910 = vrot.lane.b32.xlu0 %v901_v54, %s1695_s24  ;;  %v1230_v7 = vsel %vm1229_vm12, %v1226_v4, %v1228_v3  ;;  %v1234_v10 = vmul.bf16 %v1226_v4, %v1854_v43 }
  0x9d   : > { %v1235_v8 = vmul.bf16 %v1230_v7, %v1844_v36 }
  0x9e   : > { %1034 = vrot.lane.b32.xlu1 %v1025_v55, %s1696_s25 }
  0xa0   : > { %833 = vrot.lane.b32.xlu0 %v823_v56, %s1694_s21  ;;  %v1579_v56 = vld [vmem:[%s1966_s5 + $0x20] sm:$0xf] }
  0xa2   : > { %912 = vrot.lane.b32.xlu1 %v902_v57, %s1695_s24 }
  0xa4   : > { %908 = vrot.lane.b32.xlu0 %v900_v59, %s1695_s24 }
  0xa6   : > { %1032 = vrot.lane.b32.xlu1 %v1024_v62, %s1696_s25 }
  0xa8   : > { %1108 = vrot.lane.b32.xlu0 %v1099_v63, %s1697_s26 }
  0xaa   : > { %1170 = vrot.lane.b32.xlu1 %v1844_v36, %s1698_s27 }
  0xac   : > { %1106 = vrot.lane.b32.xlu0 %v1098_v0, %s1697_s26 }
  0xae   : > { %1110 = vrot.lane.b32.xlu1 %v1100_v1, %s1697_s26 }
  0xb0   : > { %1036 = vrot.lane.b32.xlu0 %v1026_v2, %s1696_s25  ;;  %v1700_v2 = vmov 0.0  }
  0xb1   : > { %1325 = vst.msk [vmem:[#allocation3] sm:$0xff] %vm531_vm0, %v1700_v2 }
  0xb2   : > { %1168 = vrot.lane.b32.xlu1 %v1854_v43, %s1698_s27 }
  0xb4   : > { %1172 = vrot.lane.b32.xlu0 %v1850_v41, %s1698_s27 }
  0xb6   : > { %1246 = vrot.lane.b32.xlu1 %v1236_v5, %s1699_s28 }
  0xb8   : > { %1244 = vrot.lane.b32.xlu0 %v1235_v8, %s1699_s28  ;;  %v1329_v2 = vld [vmem:[#allocation3] sm:$0xff] }
  0xba   : > { %1302 = vperm.xlu1 %1635, %v1299_v9  }
  0xbc   : > { %1242 = vrot.lane.b32.xlu0 %v1234_v10, %s1699_s28 }
  0xed   : > { %v701_v57 = vpop.f32.mrb[0].mxu1 }
  0xee   : > { %v703_v58 = vpop.f32.mrb[1].mxu1 }
 0x104   : > { %v721_v13 = vpop.permute.xlu1 %720 }
 0x106   : > { %v717_v14 = vpop.permute.xlu0 %716 }
 0x108   : > { %v830_v17 = vpop.permute.xlu1 %829 }
 0x10a   : > { %v719_v18 = vpop.permute.xlu0 %718 }
 0x10b   : > { %v723_v20 = vsel %vm722_vm13, %v717_v14, %v719_v18  ;;  %v724_v21 = vsel %vm722_vm13, %v719_v18, %v721_v13 }
 0x10c   : > { %v832_v22 = vpop.permute.xlu1 %831  ;;  %730 = vmatprep.subr.bf16.mxu0 %v724_v21 }
 0x10d   : > { %731 = vmatpush1.bf16.msra.mxu0 %v723_v20  ;;  %v836_v28 = vsel %vm835_vm14, %v830_v17, %v832_v22 }
 0x10e   : > { %v911_v24 = vpop.permute.xlu0 %910 }
 0x110   : > { %v1035_v25 = vpop.permute.xlu1 %1034  ;;  %1565 = vmatmul.mubr.msk.bf16.vlgmr.msra.gmra.mrb[4].mxu0 %vm606_vm9, %v1564_v23 }
 0x111   : > { %954 = vmatprep.mubr.bf16.mxu0 %v1686_v6 }
 0x112   : > { %v834_v26 = vpop.permute.xlu0 %833 }
 0x113   : > { %v837_v27 = vsel %vm835_vm14, %v832_v22, %v834_v26 }
 0x114   : > { %v913_v29 = vpop.permute.xlu1 %912  ;;  %843 = vmatprep.subr.bf16.mxu1 %v837_v27 }
 0x115   : > { %844 = vmatpush1.bf16.msra.mxu1 %v836_v28  ;;  %v916_v30 = vsel %vm914_vm15, %v911_v24, %v913_v29 }
 0x116   : > { %922 = vmatprep.subr.bf16.mxu0 %v916_v30  ;;  %v909_v32 = vpop.permute.xlu0 %908  ;;  %972 = vmatprep.subr.bf16.mxu1 %v1822_v15  ;;  %v1571_v15 = vld [vmem:[%s1966_s5 + $0x10] sm:$0xf] }
 0x117   : > { %v915_v33 = vsel %vm914_vm15, %v909_v32, %v911_v24 }
 0x118   : > { %v1033_v34 = vpop.permute.xlu1 %1032  ;;  %1568 = vmatmul.mubr.msk.bf16.vlgmr.msra.gmra.mrb[4].mxu1 %vm606_vm9, %v1567_v31  ;;  %923 = vmatpush1.bf16.msra.mxu0 %v915_v33 }
 0x119   : > { %973 = vmatpush1.bf16.msra.mxu1 %v1829_v19  ;;  %1004 = vmatprep.mubr.bf16.mxu1 %v1686_v6  ;;  %v1039_v43 = vsel %vm1038_vm2, %v1033_v34, %v1035_v25 }
 0x11a   : > { %v1109_v36 = vpop.permute.xlu0 %1108 }
 0x11b   : > { %1570 = vmatmul.mubr.msk.bf16.vlgmr.msra.gmra.mrb[8].mxu0 %vm606_vm9, %v1569_v35 }
 0x11c   : > { %v1171_v37 = vpop.permute.xlu1 %1170  ;;  %1078 = vmatprep.mubr.bf16.mxu0 %v1686_v6 }
 0x11e   : > { %v1107_v38 = vpop.permute.xlu0 %1106 }
 0x11f   : > { %v1113_v19 = vsel %vm1112_vm1, %v1107_v38, %v1109_v36 }
 0x120   : > { %v1111_v39 = vpop.permute.xlu1 %1110  ;;  %1572 = vmatmul.mubr.msk.bf16.vlgmr.msra.gmra.mrb[8].mxu1 %vm606_vm9, %v1571_v15 }
 0x121   : > { %v1114_v40 = vsel %vm1112_vm1, %v1109_v36, %v1111_v39  ;;  %1152 = vmatprep.mubr.bf16.mxu1 %v1686_v6 }
 0x122   : > { %1120 = vmatprep.subr.bf16.mxu1 %v1114_v40  ;;  %v1037_v41 = vpop.permute.xlu0 %1036 }
 0x123   : > { %1121 = vmatpush1.bf16.msra.mxu1 %v1113_v19  ;;  %v1040_v42 = vsel %vm1038_vm2, %v1035_v25, %v1037_v41 }
 0x124   : > { %v1169_v44 = vpop.permute.xlu1 %1168  ;;  %1046 = vmatprep.subr.bf16.mxu0 %v1040_v42 }
 0x125   : > { %1047 = vmatpush1.bf16.msra.mxu0 %v1039_v43  ;;  %v1175_v49 = vsel %vm1174_vm3, %v1169_v44, %v1171_v37 }
 0x126   : > { %v1173_v46 = vpop.permute.xlu0 %1172 }
 0x127   : > { %v1176_v48 = vsel %vm1174_vm3, %v1171_v37, %v1173_v46 }
 0x128   : > { %1574 = vmatmul.mubr.msk.bf16.vlgmr.msra.gmra.mrb[12].mxu0 %vm606_vm9, %v1573_v45  ;;  %1182 = vmatprep.subr.bf16.mxu0 %v1176_v48  ;;  %v1247_v50 = vpop.permute.xlu1 %1246 }
 0x129   : > { %1183 = vmatpush1.bf16.msra.mxu0 %v1175_v49  ;;  %1576 = vmatmul.mubr.msk.bf16.vlgmr.msra.gmra.mrb[12].mxu1 %vm606_vm9, %v1575_v47 }
 0x12a   : > { %v1245_v51 = vpop.permute.xlu0 %1244  ;;  %1214 = vmatprep.mubr.bf16.mxu0 %v1686_v6  ;;  %1288 = vmatprep.mubr.bf16.mxu1 %v1686_v6  ;;  %v705_v6 = vpop.f32.mrb[2].mxu1 }
 0x12b   : > { %v1250_v52 = vsel %vm1248_vm4, %v1245_v51, %v1247_v50  ;;  %v706_v59 = vpop.f32.mrb[3].mxu1 }
 0x12c   : > { %1256 = vmatprep.subr.bf16.mxu1 %v1250_v52 }
 0x12e   : > { %v1243_v54 = vpop.permute.xlu0 %1242 }
 0x12f   : > { %v1249_v55 = vsel %vm1248_vm4, %v1243_v54, %v1245_v51 }
 0x130   : > { %1578 = vmatmul.mubr.msk.bf16.vlgmr.msra.gmra.mrb[16].mxu0 %vm606_vm9, %v1577_v53  ;;  %1257 = vmatpush1.bf16.msra.mxu1 %v1249_v55 }
 0x133   : > { %1580 = vmatmul.mubr.msk.bf16.vlgmr.msra.gmra.mrb[16].mxu1 %vm606_vm9, %v1579_v56 }
 0x139   : > { %v1303_v47 = vpop.permute.xlu1 %1302 }
 0x16c   : > { %v644_v60 = vpop.f32.mrb[0].mxu0 }
 0x16d   : > { %v646_v61 = vpop.f32.mrb[1].mxu0  ;;  %v702_v62 = vadd.f32 %v701_v57, %v644_v60 }
 0x16e   : > { %v648_v63 = vpop.f32.mrb[2].mxu0  ;;  %v704_v0 = vadd.f32 %v703_v58, %v646_v61 }
 0x16f   : > { %v649_v1 = vpop.f32.mrb[3].mxu0 }
 0x1e3   : > { %v764_v3 = vpop.f32.mrb[4].mxu0 }
 0x1e4   : > { %v771_v4 = vadd.f32 %v764_v3, %v702_v62  ;;  %v766_v5 = vpop.f32.mrb[5].mxu0 }
 0x1e5   : > { %v772_v7 = vadd.f32 %v766_v5, %v704_v0  ;;  %v768_v8 = vpop.f32.mrb[6].mxu0  ;;  %v1337_v5 = vld [vmem:[%s1968_s7] sm:$0xff] }
 0x1e6   : > { %v769_v9 = vpop.f32.mrb[7].mxu0 }
 0x1eb   : > { %v877_v10 = vpop.f32.mrb[4].mxu1 }
 0x1ec   : > { %v884_v13 = vadd.f32 %v877_v10, %v771_v4  ;;  %v879_v14 = vpop.f32.mrb[5].mxu1 }
 0x1ed   : > { %v885_v17 = vadd.f32 %v879_v14, %v772_v7  ;;  %v881_v18 = vpop.f32.mrb[6].mxu1 }
 0x1ee   : > { %v956_v20 = vpop.f32.mrb[8].mxu0  ;;  %v882_v21 = vpop.f32.mrb[7].mxu1 }
 0x1ef   : > { %v963_v22 = vadd.f32 %v956_v20, %v884_v13  ;;  %v958_v23 = vpop.f32.mrb[9].mxu0  ;;  %v1346_v21 = vld [vmem:[#allocation4] sm:$0x1] }
 0x1f0   : > { %v964_v24 = vadd.f32 %v958_v23, %v885_v17  ;;  %v960_v25 = vpop.f32.mrb[10].mxu0 }
 0x1f1   : > { %v961_v26 = vpop.f32.mrb[11].mxu0  ;;  %v1349_v25 = vld [vmem:[%s1970_s9] sm:$0xff] }
 0x1f3   : > { %v1006_v27 = vpop.f32.mrb[8].mxu1 }
 0x1f4   : > { %v1013_v28 = vadd.f32 %v1006_v27, %v963_v22  ;;  %v1008_v29 = vpop.f32.mrb[9].mxu1  ;;  %v1356_v27 = vld [vmem:[%s1971_s10] sm:$0xff] }
 0x1f5   : > { %v1014_v30 = vadd.f32 %v1008_v29, %v964_v24  ;;  %v1010_v31 = vpop.f32.mrb[10].mxu1 }
 0x1f6   : > { %v1011_v32 = vpop.f32.mrb[11].mxu1 }
 0x1fb   : > { %v1080_v33 = vpop.f32.mrb[12].mxu0 }
 0x1fc   : > { %v1087_v34 = vadd.f32 %v1080_v33, %v1013_v28  ;;  %v1082_v35 = vpop.f32.mrb[13].mxu0  ;;  %v1154_v36 = vpop.f32.mrb[12].mxu1 }
 0x1fd   : > { %v1088_v37 = vadd.f32 %v1082_v35, %v1014_v30  ;;  %v1156_v15 = vpop.f32.mrb[13].mxu1  ;;  %v1084_v38 = vpop.f32.mrb[14].mxu0  ;;  %v1391_v35 = vld [vmem:[#allocation5] sm:$0x1] }
 0x1fe   : > { %v1161_v39 = vadd.f32 %v1154_v36, %v1087_v34  ;;  %v1085_v40 = vpop.f32.mrb[15].mxu0  ;;  %v1158_v19 = vpop.f32.mrb[14].mxu1  ;;  %v1371_v34 = vld [vmem:[%s1972_s11] sm:$0xff] }
 0x1ff   : > { %v1162_v41 = vadd.f32 %v1156_v15, %v1088_v37  ;;  %v1159_v42 = vpop.f32.mrb[15].mxu1 }
 0x203   : > { %v1216_v43 = vpop.f32.mrb[16].mxu0 }
 0x204   : > { %v1223_v44 = vadd.f32 %v1216_v43, %v1161_v39  ;;  %v1218_v45 = vpop.f32.mrb[17].mxu0 }
 0x205   : > { %v1224_v46 = vadd.f32 %v1218_v45, %v1162_v41  ;;  %v1220_v48 = vpop.f32.mrb[18].mxu0 }
 0x206   : > { %v1290_v49 = vpop.f32.mrb[16].mxu1  ;;  %v1221_v50 = vpop.f32.mrb[19].mxu0 }
 0x207   : > { %v1297_v51 = vadd.f32 %v1290_v49, %v1223_v44  ;;  %v1292_v52 = vpop.f32.mrb[17].mxu1 }
 0x208   : > { %v1298_v53 = vadd.f32 %v1292_v52, %v1224_v46  ;;  %v1294_v54 = vpop.f32.mrb[18].mxu1 }
 0x209   : > { %v1305_v55 = vadd.f32 %v1303_v47, %v1297_v51  ;;  %v1295_v56 = vpop.f32.mrb[19].mxu1 }
 0x20a   : > { %v1306_v57 = vadd.f32 %v1303_v47, %v1298_v53 }
 0x20b   : > { %v1581_v58 = vmul.f32 -1.442695, %v1305_v55 }
 0x20c   : > { %v1582_v6 = vmul.f32 -1.442695, %v1306_v57 }
 0x20d   : > { %1641 = vpow2.f32 %v1581_v58 }
 0x20e   : > { %1643 = vpow2.f32 %v1582_v6 }
 0x217   : > { %v1642_v59 = vpop.eup %1641 }
 0x218   : > { %v1644_v60 = vpop.eup %1643  ;;  %v1313_v61 = vadd.f32 1.0, %v1642_v59 }
 0x219   : > { %v1314_v62 = vadd.f32 1.0, %v1644_v60 }
 0x21a   : > { %1645 = vrcp.f32 %v1313_v61  ;;  %v1415_v61 = vunpack.c.l.bf16 %v1816_v11 }
 0x21b   : > { %1647 = vrcp.f32 %v1314_v62  ;;  %v1417_v62 = vunpack.c.l.bf16 %v1818_v12 }
 0x224   : > { %v1646_v63 = vpop.eup %1645 }
 0x225   : > { %v1648_v0 = vpop.eup %1647 }
 0x226   : > { %v1330_v1 = vadd.f32 %v1648_v0, %v1646_v63 }
 0x228   : > { %1331 = vadd.xlane.f32.xlu0 %v1330_v1 }
 0x2b5   : > { %v1332_v3 = vpop.xlane.xlu0 %1331 }
 0x2b6   : > { %v1333_v4 = vadd.f32 %v1332_v3, %v1329_v2 }
 0x2b8   : > { %1334 = vst.msk [vmem:[#allocation3] sm:$0xff] %vm531_vm0, %v1333_v4 }
 0x2bf   : > { %v1335_v7 = vld [vmem:[#allocation3] sm:$0xff] }
 0x2c0   : > { %v1336_v8 = vmul.f32 0.00390625, %v1335_v7 }
 0x2c2   : > { %v1338_v9 = vmul.f32 %v1337_v5, %v1336_v8 }
 0x2c4   : > { %v1339_v10 = vsel %vm531_vm0, %v1338_v9, 0.0 }
 0x2c5   : > { %v1340_v13 = vrot.slane %v1339_v10, 4 }
 0x2c7   : > { %v1341_v14 = vadd.f32 %v1340_v13, %v1339_v10 }
 0x2c9   : > { %v1342_v17 = vrot.slane %v1341_v14, 2 }
 0x2cb   : > { %v1343_v18 = vadd.f32 %v1342_v17, %v1341_v14 }
 0x2cd   : > { %v1344_v20 = vrot.slane %v1343_v18, 1 }
 0x2cf   : > { %v1345_v22 = vadd.f32 %v1344_v20, %v1343_v18 }
 0x2d1   : > { %v1347_v23 = vadd.f32 %v1346_v21, %v1345_v22 }
 0x2d3   : > { %v1348_v24 = vmax.f32 %v1347_v23, 0.0 }
 0x2d5   : > { %v1353_v26 = vrot.slane %v1348_v24, %v1824_v16 }
 0x2d7   : > { %v1354_v28 = vmul.f32 %v1353_v26, %v1349_v25 }
 0x2d9   : > { %v1357_v29 = vadd.f32 %v1356_v27, %v1354_v28 }
 0x2db   : > { %v1583_v30 = vmul.f32 -1.442695, %v1357_v29 }
 0x2dd   : > { %1649 = vpow2.f32 %v1583_v30 }
 0x2e7   : > { %v1650_v31 = vpop.eup %1649 }
 0x2e8   : > { %v1361_v32 = vadd.f32 1.0, %v1650_v31 }
 0x2ea   : > { %1651 = vrcp.f32 %v1361_v32 }
 0x2f4   : > { %v1652_v33 = vpop.eup %1651 }
 0x2f5   : > { %1366 = vperm.xlu1 %1635, %v1652_v33  }
 0x2f9   : > { %1374 = vperm.xlu1 %1635, %v1371_v34  }
 0x2fd   : > { %1394 = vperm.xlu1 %1635, %v1391_v35  }
 0x374   : > { %v1367_v36 = vpop.permute.xlu1 %1366 }
 0x375   : > { %v1369_v37 = vmul.f32 %v1646_v63, %v1367_v36  ;;  %v1370_v15 = vmul.f32 %v1648_v0, %v1367_v36  ;;  %v1416_v63 = vunpack.c.h.bf16 %v1816_v11 }
 0x378   : > { %v1375_v38 = vpop.permute.xlu1 %1374 }
 0x379   : > { %v1377_v39 = vmul.f32 %v1375_v38, %v1369_v37  ;;  %v1378_v40 = vmul.f32 %v1375_v38, %v1370_v15 }
 0x37b   : > { %v1379_v19 = vrot.slane %v1377_v39, 4  ;;  %v1385_v41 = vrot.slane %v1378_v40, 4 }
 0x37c   : > { %v1395_v48 = vpop.permute.xlu1 %1394 }
 0x37d   : > { %v1380_v42 = vadd.f32 %v1379_v19, %v1377_v39  ;;  %v1386_v43 = vadd.f32 %v1385_v41, %v1378_v40  ;;  %v1400_v53 = vrot.slane %v1395_v48, %v1824_v16  ;;  %v1418_v16 = vunpack.c.h.bf16 %v1818_v12 }
 0x37f   : > { %v1381_v44 = vrot.slane %v1380_v42, 2  ;;  %v1387_v45 = vrot.slane %v1386_v43, 2 }
 0x381   : > { %v1382_v46 = vadd.f32 %v1381_v44, %v1380_v42  ;;  %v1388_v47 = vadd.f32 %v1387_v45, %v1386_v43 }
 0x383   : > { %v1383_v49 = vrot.slane %v1382_v46, 1  ;;  %v1389_v50 = vrot.slane %v1388_v47, 1 }
 0x385   : > { %v1384_v51 = vadd.f32 %v1383_v49, %v1382_v46  ;;  %v1390_v52 = vadd.f32 %v1389_v50, %v1388_v47 }
 0x387   : > { %v1401_v54 = vadd.f32 %v1400_v53, %v1384_v51  ;;  %v1402_v55 = vadd.f32 %v1400_v53, %v1390_v52 }
 0x389   : > { %v1584_v56 = vmul.f32 -1.442695, %v1401_v54  ;;  %v1585_v57 = vmul.f32 -1.442695, %v1402_v55 }
 0x38b   : > { %1653 = vpow2.f32 %v1584_v56 }
 0x38c   : > { %1655 = vpow2.f32 %v1585_v57 }
 0x395   : > { %v1654_v58 = vpop.eup %1653 }
 0x396   : > { %v1656_v6 = vpop.eup %1655  ;;  %v1409_v59 = vadd.f32 1.0, %v1654_v58 }
 0x397   : > { %v1410_v60 = vadd.f32 1.0, %v1656_v6 }
 0x398   : > { %1657 = vrcp.f32 %v1409_v59 }
 0x399   : > { %1659 = vrcp.f32 %v1410_v60 }
 0x3a2   : > { %v1658_v0 = vpop.eup %1657 }
 0x3a3   : > { %v1660_v1 = vpop.eup %1659  ;;  %v1419_v2 = vmul.f32 %v1658_v0, %v1415_v61  ;;  %v1421_v3 = vmul.f32 %v1658_v0, %v1417_v62 }
 0x3a4   : > { %v1420_v4 = vmul.f32 %v1660_v1, %v1416_v63  ;;  %v1422_v5 = vmul.f32 %v1660_v1, %v1418_v16 }
 0x3a6   : > { %v1593_v7 = vpack.c.bf16 %v1420_v4, %v1419_v2  ;;  %v1594_v8 = vpack.c.bf16 %v1422_v5, %v1421_v3 }
 0x3a8   : > { %1435 = vst [vmem:[%s525_s12] sm:$0xff] %v1593_v7  ;;  %1436 = vst [vmem:[%s525_s12 + $0x8] sm:$0xff] %v1594_v8 }
 0x3a9 PF: > { %s27_s14 = sadd.s32 1, %s1683_s14   ;;  %s1975_s29 = smov %s1679_s30 }
 0x3aa   : > { %p24_p5 = scmp.ge.s32.totalorder %s27_s14, 4   ;;  %s1976_s30 = smov %s1978_s8 }
 0x3ac   :  { %26 = sbr.rel (!%p24_p5) target bundleno = 3 (0x3), region = 121 }

</bundles_post_ra>
